<compile_context>
chip_gen: v7x
topology: tpu7x:2x2x1
jax: 0.10.0
libtpu: 0.0.40
codegen_flags: <defaults>
</compile_context>

<pallas_src>
import functools

import jax
import jax.numpy as jnp
from jax.experimental import pallas as pl
from jax.experimental.pallas import tpu as pltpu


def _co_att_kernel(s_ref, t_ref, wqkv_ref, w1_ref, b1_ref, w2_ref, b2_ref,
                   g_ref, beta_ref, out_ref, *, inv_temp, eps):
    tm, D = s_ref.shape

    # Stack the two streams along rows -> one wide MXU call instead of six.
    x = jnp.concatenate([s_ref[...], t_ref[...]], axis=0).astype(jnp.float32)  # (2tm, D)
    qkv = jnp.dot(x, wqkv_ref[...], preferred_element_type=jnp.float32)        # (2tm, 3D)
    q, k, v = qkv[:, :D], qkv[:, D:2 * D], qkv[:, 2 * D:]

    # "Swapped" partner stream (rows [t; s]) for the cross terms.
    k_sw = jnp.concatenate([k[tm:], k[:tm]], axis=0)
    v_sw = jnp.concatenate([v[tm:], v[:tm]], axis=0)

    # 2x2 attention logits per (b, l) position, for both streams at once.
    a_self = jnp.sum(q * k, axis=-1, keepdims=True) * inv_temp                 # [qs.ks ; qt.kt]
    a_cross = jnp.sum(q * k_sw, axis=-1, keepdims=True) * inv_temp             # [qs.kt ; qt.ks]

    # Numerically stable 2-way softmax; divide replaced by EUP reciprocal.
    m = jnp.maximum(a_self, a_cross)
    e_self = jnp.exp(a_self - m)
    e_cross = jnp.exp(a_cross - m)
    inv_d = pl.reciprocal(e_self + e_cross, approx=True)
    h = (e_self * inv_d) * v + (e_cross * inv_d) * v_sw                        # (2tm, D) attn_h

    # FFN batched over both streams (2 matmuls instead of 4) + residual.
    z = jnp.dot(h, w1_ref[...], preferred_element_type=jnp.float32) + b1_ref[...]
    z = jnp.maximum(z, 0.0)
    o = jnp.dot(z, w2_ref[...], preferred_element_type=jnp.float32) + b2_ref[...] + h

    # One-pass LayerNorm: var = E[x^2] - mu^2 (half the cross-lane reductions).
    mu = jnp.mean(o, axis=-1, keepdims=True)
    var = jnp.maximum(jnp.mean(o * o, axis=-1, keepdims=True) - mu * mu, 0.0)
    y = (o - mu) * jax.lax.rsqrt(var + eps) * g_ref[...] + beta_ref[...]

    # Lane-dense store: a single (tm, 2D) tile [att_s | att_t].
    out_ref[...] = jnp.concatenate([y[:tm], y[tm:]], axis=1).astype(out_ref.dtype)


def co_att(seq_s, seq_t, params, *, tile_m=None, vmem_limit_bytes=None):
    """seq_s, seq_t: [B, L, D] -> (att_s, att_t), each [B, L, D]."""
    B, L, D = seq_s.shape
    M = B * L
    if tile_m is None:
        # Large row tiles amortize the ~0.35us/grid-step pipeline overhead;
        # per-row VMEM is tiny so 512 rows is cheap.  On v7x keep the grid >= 2
        # by passing a smaller tile_m explicitly if M > 512.
        tile_m = min(M, 512)
    tile_m = min(tile_m, M)
    assert M % tile_m == 0 and (tile_m % 8 == 0 or tile_m == M), \
        "B*L must be divisible by tile_m, and tile_m must be sublane-aligned"
    H = params["w1"].shape[1]
    inv_temp = 1.0 / (float(D) ** 0.5)

    s2 = seq_s.reshape(M, D)
    t2 = seq_t.reshape(M, D)
    # Fused projection weight [Wq | Wk | Wv] -> one (D, 3D) MXU operand.
    wqkv = jnp.concatenate([params["wq"], params["wk"], params["wv"]], axis=1)

    row_spec = pl.BlockSpec((tile_m, D), lambda i: (i, 0))
    out_spec = pl.BlockSpec((tile_m, 2 * D), lambda i: (i, 0))
    const = lambda shape: pl.BlockSpec(shape, lambda i: (0, 0))

    kernel = functools.partial(_co_att_kernel, inv_temp=inv_temp, eps=1e-6)

    cp_kwargs = dict(dimension_semantics=("parallel",))
    if vmem_limit_bytes is not None:
        # Raise when pushing tile_m to 1024+ on v6e (default scoped VMEM 32MiB).
        cp_kwargs["vmem_limit_bytes"] = vmem_limit_bytes

    out = pl.pallas_call(
        kernel,
        out_shape=jax.ShapeDtypeStruct((M, 2 * D), seq_s.dtype),
        grid_spec=pltpu.PrefetchScalarGridSpec(
            num_scalar_prefetch=0,
            grid=(M // tile_m,),
            in_specs=[
                row_spec, row_spec,                 # seq_s rows, seq_t rows
                const((D, 3 * D)),                  # fused [Wq|Wk|Wv]
                const((D, H)), const((1, H)),       # FFN layer 1
                const((H, D)), const((1, D)),       # FFN layer 2
                const((1, D)), const((1, D)),       # LayerNorm gamma, beta
            ],
            out_specs=out_spec,
        ),
        compiler_params=pltpu.CompilerParams(**cp_kwargs),
    )(s2, t2, wqkv,
      params["w1"], params["b1"], params["w2"], params["b2"],
      params["gamma"], params["beta"])

    att_s = out[:, :D].reshape(B, L, D)
    att_t = out[:, D:].reshape(B, L, D)
    return att_s, att_t


def init_params(key, dim):
    """Deterministic synthetic parameters matching Co_Att.__init__(dim)."""
    h = int(dim * 0.5)
    ks = jax.random.split(key, 6)
    scale = 1.0 / (dim ** 0.5)
    # Stored pre-transposed so the kernel computes x @ W (== x @ W_pt.T).
    return {
        "wq": jax.random.normal(ks[0], (dim, dim), jnp.float32) * scale,
        "wk": jax.random.normal(ks[1], (dim, dim), jnp.float32) * scale,
        "wv": jax.random.normal(ks[2], (dim, dim), jnp.float32) * scale,
        "w1": jax.random.normal(ks[3], (dim, h), jnp.float32) * scale,
        "b1": jnp.zeros((1, h), jnp.float32),
        "w2": jax.random.normal(ks[4], (h, dim), jnp.float32) * (1.0 / (h ** 0.5)),
        "b2": jnp.zeros((1, dim), jnp.float32),
        "gamma": jnp.ones((1, dim), jnp.float32),
        "beta": jnp.zeros((1, dim), jnp.float32),
    }


if __name__ == "__main__":
    B, L, D = 2, 8, 32          # small shapes consistent with Co_Att(dim=32)
    key = jax.random.PRNGKey(0)
    k_s, k_t, k_p = jax.random.split(key, 3)
    seq_s = jax.random.normal(k_s, (B, L, D), jnp.float32)
    seq_t = jax.random.normal(k_t, (B, L, D), jnp.float32)
    params = init_params(k_p, D)

    att_s, att_t = co_att(seq_s, seq_t, params)
    jax.block_until_ready((att_s, att_t))

    # Pure-JAX reference (mirrors the PyTorch forward in eval mode).
    h = jnp.stack([seq_s, seq_t], axis=2)                      # [B, L, 2, D]
    q = h @ params["wq"]; k = h @ params["wk"]; v = h @ params["wv"]
    attn = jax.nn.softmax((q / (D ** 0.5)) @ jnp.swapaxes(k, 2, 3), axis=-1)
    attn_h = attn @ v
    ffn = jnp.maximum(attn_h @ params["w1"] + params["b1"][0], 0.0) @ params["w2"] + params["b2"][0]
    attn_o = ffn + attn_h
    mu = attn_o.mean(-1, keepdims=True)
    var = ((attn_o - mu) ** 2).mean(-1, keepdims=True)
    attn_o = (attn_o - mu) / jnp.sqrt(var + 1e-6) * params["gamma"][0] + params["beta"][0]
    ref_s, ref_t = attn_o[:, :, 0, :], attn_o[:, :, 1, :]

    # Tolerance is slightly relaxed (2e-3) because the kernel uses the EUP
    # approximate reciprocal in the softmax and a one-pass variance in the LN.
    assert jnp.allclose(att_s, ref_s, atol=2e-3, rtol=2e-3)
    assert jnp.allclose(att_t, ref_t, atol=2e-3, rtol=2e-3)
    print("KERNEL_OK")
</pallas_src>

<mosaic_0001>
module attributes {stable_mosaic.version = 11 : i64} {
  func.func @_co_att_kernel(%arg0: i32, %arg1: memref<16x32xf32, #tpu.memory_space<vmem>>, %arg2: memref<16x32xf32, #tpu.memory_space<vmem>>, %arg3: memref<32x96xf32, #tpu.memory_space<vmem>>, %arg4: memref<32x16xf32, #tpu.memory_space<vmem>>, %arg5: memref<1x16xf32, #tpu.memory_space<vmem>>, %arg6: memref<16x32xf32, #tpu.memory_space<vmem>>, %arg7: memref<1x32xf32, #tpu.memory_space<vmem>>, %arg8: memref<1x32xf32, #tpu.memory_space<vmem>>, %arg9: memref<1x32xf32, #tpu.memory_space<vmem>>, %arg10: memref<16x64xf32, #tpu.memory_space<vmem>>) attributes {dimension_semantics = [#tpu.dimension_semantics<parallel>], iteration_bounds = array<i64: 1>, scalar_prefetch = 0 : i64, scratch_operands = 0 : i64, tpu.core_type = #tpu.core_type<tc>, window_params = [{transform_indices = @transform_0, window_bounds = array<i64: 16, 32>}, {transform_indices = @transform_1, window_bounds = array<i64: 16, 32>}, {pipeline_mode = #tpu.pipeline_mode<synchronous>, transform_indices = @transform_2, window_bounds = array<i64: 32, 96>}, {pipeline_mode = #tpu.pipeline_mode<synchronous>, transform_indices = @transform_3, window_bounds = array<i64: 32, 16>}, {pipeline_mode = #tpu.pipeline_mode<synchronous>, transform_indices = @transform_4, window_bounds = array<i64: 1, 16>}, {pipeline_mode = #tpu.pipeline_mode<synchronous>, transform_indices = @transform_5, window_bounds = array<i64: 16, 32>}, {pipeline_mode = #tpu.pipeline_mode<synchronous>, transform_indices = @transform_6, window_bounds = array<i64: 1, 32>}, {pipeline_mode = #tpu.pipeline_mode<synchronous>, transform_indices = @transform_7, window_bounds = array<i64: 1, 32>}, {pipeline_mode = #tpu.pipeline_mode<synchronous>, transform_indices = @transform_8, window_bounds = array<i64: 1, 32>}, {transform_indices = @transform_9, window_bounds = array<i64: 16, 64>}]} {
    %c0 = arith.constant 0 : index
    %c0_0 = arith.constant 0 : index
    %0 = vector.load %arg1[%c0, %c0_0] : memref<16x32xf32, #tpu.memory_space<vmem>>, vector<16x32xf32>
    %c0_1 = arith.constant 0 : index
    %c0_2 = arith.constant 0 : index
    %1 = vector.load %arg2[%c0_1, %c0_2] : memref<16x32xf32, #tpu.memory_space<vmem>>, vector<16x32xf32>
    %2 = tpu.concatenate %0, %1 in 0 : vector<16x32xf32>, vector<16x32xf32> -> vector<32x32xf32>
    %c0_3 = arith.constant 0 : index
    %c0_4 = arith.constant 0 : index
    %3 = vector.load %arg3[%c0_3, %c0_4] : memref<32x96xf32, #tpu.memory_space<vmem>>, vector<32x96xf32>
    %cst = arith.constant dense<0.000000e+00> : vector<32x96xf32>
    %4 = tpu.matmul %2, %3, %cst {dimension_numbers = #tpu.dot_dimension_numbers<[1], [0], [0], [1], [0, 0, 1, 1], [], []>} : vector<32x32xf32>, vector<32x96xf32>, vector<32x96xf32> -> vector<32x96xf32>
    %5 = vector.extract_strided_slice %4 {offsets = [0, 0], sizes = [32, 32], strides = [1, 1]} : vector<32x96xf32> to vector<32x32xf32>
    %6 = vector.extract_strided_slice %4 {offsets = [0, 32], sizes = [32, 32], strides = [1, 1]} : vector<32x96xf32> to vector<32x32xf32>
    %7 = vector.extract_strided_slice %4 {offsets = [0, 64], sizes = [32, 32], strides = [1, 1]} : vector<32x96xf32> to vector<32x32xf32>
    %8 = vector.extract_strided_slice %6 {offsets = [16, 0], sizes = [16, 32], strides = [1, 1]} : vector<32x32xf32> to vector<16x32xf32>
    %9 = vector.extract_strided_slice %6 {offsets = [0, 0], sizes = [16, 32], strides = [1, 1]} : vector<32x32xf32> to vector<16x32xf32>
    %10 = tpu.concatenate %8, %9 in 0 : vector<16x32xf32>, vector<16x32xf32> -> vector<32x32xf32>
    %11 = vector.extract_strided_slice %7 {offsets = [16, 0], sizes = [16, 32], strides = [1, 1]} : vector<32x32xf32> to vector<16x32xf32>
    %12 = vector.extract_strided_slice %7 {offsets = [0, 0], sizes = [16, 32], strides = [1, 1]} : vector<32x32xf32> to vector<16x32xf32>
    %13 = tpu.concatenate %11, %12 in 0 : vector<16x32xf32>, vector<16x32xf32> -> vector<32x32xf32>
    %14 = arith.mulf %5, %6 : vector<32x32xf32>
    %cst_5 = arith.constant dense<0.000000e+00> : vector<32xf32>
    %15 = vector.multi_reduction <add>, %14, %cst_5 [1] : vector<32x32xf32> to vector<32xf32>
    %16 = vector.shape_cast %15 : vector<32xf32> to vector<32x1xf32>
    %cst_6 = arith.constant 0.176776692 : f32
    %17 = vector.broadcast %cst_6 : f32 to vector<32x1xf32>
    %18 = arith.mulf %16, %17 : vector<32x1xf32>
    %19 = arith.mulf %5, %10 : vector<32x32xf32>
    %cst_7 = arith.constant dense<0.000000e+00> : vector<32xf32>
    %20 = vector.multi_reduction <add>, %19, %cst_7 [1] : vector<32x32xf32> to vector<32xf32>
    %21 = vector.shape_cast %20 : vector<32xf32> to vector<32x1xf32>
    %cst_8 = arith.constant 0.176776692 : f32
    %22 = vector.broadcast %cst_8 : f32 to vector<32x1xf32>
    %23 = arith.mulf %21, %22 : vector<32x1xf32>
    %24 = arith.maximumf %18, %23 : vector<32x1xf32>
    %25 = arith.subf %18, %24 : vector<32x1xf32>
    %26 = math.exp %25 : vector<32x1xf32>
    %27 = arith.subf %23, %24 : vector<32x1xf32>
    %28 = math.exp %27 : vector<32x1xf32>
    %29 = arith.addf %26, %28 : vector<32x1xf32>
    %30 = tpu.reciprocal %29 {approx = true} : vector<32x1xf32> -> vector<32x1xf32>
    %31 = arith.mulf %26, %30 : vector<32x1xf32>
    %32 = vector.broadcast %31 : vector<32x1xf32> to vector<32x32xf32>
    %33 = arith.mulf %32, %7 : vector<32x32xf32>
    %34 = arith.mulf %28, %30 : vector<32x1xf32>
    %35 = vector.broadcast %34 : vector<32x1xf32> to vector<32x32xf32>
    %36 = arith.mulf %35, %13 : vector<32x32xf32>
    %37 = arith.addf %33, %36 : vector<32x32xf32>
    %c0_9 = arith.constant 0 : index
    %c0_10 = arith.constant 0 : index
    %38 = vector.load %arg4[%c0_9, %c0_10] : memref<32x16xf32, #tpu.memory_space<vmem>>, vector<32x16xf32>
    %cst_11 = arith.constant dense<0.000000e+00> : vector<32x16xf32>
    %39 = tpu.matmul %37, %38, %cst_11 {dimension_numbers = #tpu.dot_dimension_numbers<[1], [0], [0], [1], [0, 0, 1, 1], [], []>} : vector<32x32xf32>, vector<32x16xf32>, vector<32x16xf32> -> vector<32x16xf32>
    %c0_12 = arith.constant 0 : index
    %c0_13 = arith.constant 0 : index
    %40 = vector.load %arg5[%c0_12, %c0_13] : memref<1x16xf32, #tpu.memory_space<vmem>>, vector<1x16xf32>
    %41 = vector.broadcast %40 : vector<1x16xf32> to vector<32x16xf32>
    %42 = arith.addf %39, %41 : vector<32x16xf32>
    %cst_14 = arith.constant 0.000000e+00 : f32
    %43 = vector.broadcast %cst_14 : f32 to vector<32x16xf32>
    %44 = arith.maximumf %42, %43 : vector<32x16xf32>
    %c0_15 = arith.constant 0 : index
    %c0_16 = arith.constant 0 : index
    %45 = vector.load %arg6[%c0_15, %c0_16] : memref<16x32xf32, #tpu.memory_space<vmem>>, vector<16x32xf32>
    %cst_17 = arith.constant dense<0.000000e+00> : vector<32x32xf32>
    %46 = tpu.matmul %44, %45, %cst_17 {dimension_numbers = #tpu.dot_dimension_numbers<[1], [0], [0], [1], [0, 0, 1, 1], [], []>} : vector<32x16xf32>, vector<16x32xf32>, vector<32x32xf32> -> vector<32x32xf32>
    %c0_18 = arith.constant 0 : index
    %c0_19 = arith.constant 0 : index
    %47 = vector.load %arg7[%c0_18, %c0_19] : memref<1x32xf32, #tpu.memory_space<vmem>>, vector<1x32xf32>
    %48 = vector.broadcast %47 : vector<1x32xf32> to vector<32x32xf32>
    %49 = arith.addf %46, %48 : vector<32x32xf32>
    %50 = arith.addf %49, %37 : vector<32x32xf32>
    %cst_20 = arith.constant dense<0.000000e+00> : vector<32xf32>
    %51 = vector.multi_reduction <add>, %50, %cst_20 [1] : vector<32x32xf32> to vector<32xf32>
    %52 = vector.shape_cast %51 : vector<32xf32> to vector<32x1xf32>
    %cst_21 = arith.constant 3.200000e+01 : f32
    %53 = vector.broadcast %cst_21 : f32 to vector<32x1xf32>
    %54 = arith.divf %52, %53 : vector<32x1xf32>
    %55 = arith.mulf %50, %50 : vector<32x32xf32>
    %cst_22 = arith.constant dense<0.000000e+00> : vector<32xf32>
    %56 = vector.multi_reduction <add>, %55, %cst_22 [1] : vector<32x32xf32> to vector<32xf32>
    %57 = vector.shape_cast %56 : vector<32xf32> to vector<32x1xf32>
    %cst_23 = arith.constant 3.200000e+01 : f32
    %58 = vector.broadcast %cst_23 : f32 to vector<32x1xf32>
    %59 = arith.divf %57, %58 : vector<32x1xf32>
    %60 = arith.mulf %54, %54 : vector<32x1xf32>
    %61 = arith.subf %59, %60 : vector<32x1xf32>
    %cst_24 = arith.constant 0.000000e+00 : f32
    %62 = vector.broadcast %cst_24 : f32 to vector<32x1xf32>
    %63 = arith.maximumf %61, %62 : vector<32x1xf32>
    %64 = vector.broadcast %54 : vector<32x1xf32> to vector<32x32xf32>
    %65 = arith.subf %50, %64 : vector<32x32xf32>
    %cst_25 = arith.constant 9.99999997E-7 : f32
    %66 = vector.broadcast %cst_25 : f32 to vector<32x1xf32>
    %67 = arith.addf %63, %66 : vector<32x1xf32>
    %68 = math.rsqrt %67 : vector<32x1xf32>
    %69 = vector.broadcast %68 : vector<32x1xf32> to vector<32x32xf32>
    %70 = arith.mulf %65, %69 : vector<32x32xf32>
    %c0_26 = arith.constant 0 : index
    %c0_27 = arith.constant 0 : index
    %71 = vector.load %arg8[%c0_26, %c0_27] : memref<1x32xf32, #tpu.memory_space<vmem>>, vector<1x32xf32>
    %72 = vector.broadcast %71 : vector<1x32xf32> to vector<32x32xf32>
    %73 = arith.mulf %70, %72 : vector<32x32xf32>
    %c0_28 = arith.constant 0 : index
    %c0_29 = arith.constant 0 : index
    %74 = vector.load %arg9[%c0_28, %c0_29] : memref<1x32xf32, #tpu.memory_space<vmem>>, vector<1x32xf32>
    %75 = vector.broadcast %74 : vector<1x32xf32> to vector<32x32xf32>
    %76 = arith.addf %73, %75 : vector<32x32xf32>
    %77 = vector.extract_strided_slice %76 {offsets = [0, 0], sizes = [16, 32], strides = [1, 1]} : vector<32x32xf32> to vector<16x32xf32>
    %78 = vector.extract_strided_slice %76 {offsets = [16, 0], sizes = [16, 32], strides = [1, 1]} : vector<32x32xf32> to vector<16x32xf32>
    %79 = tpu.concatenate %77, %78 in 1 : vector<16x32xf32>, vector<16x32xf32> -> vector<16x64xf32>
    %c0_30 = arith.constant 0 : index
    %c0_31 = arith.constant 0 : index
    %80 = vector.load %arg10[%c0_30, %c0_31] : memref<16x64xf32, #tpu.memory_space<vmem>>, vector<16x64xf32>
    tpu.vector_store %arg10[%c0_30, %c0_31], %79 {strides = array<i32>} : memref<16x64xf32, #tpu.memory_space<vmem>>, vector<16x64xf32>,
    return
  }
  func.func @transform_0(%arg0: i32) -> (i32, i32) {
    %c0_i32 = arith.constant 0 : i32
    %c0_i32_0 = arith.constant 0 : i32
    return %arg0, %c0_i32 : i32, i32
  }
  func.func @transform_1(%arg0: i32) -> (i32, i32) {
    %c0_i32 = arith.constant 0 : i32
    %c0_i32_0 = arith.constant 0 : i32
    return %arg0, %c0_i32 : i32, i32
  }
  func.func @transform_2(%arg0: i32) -> (i32, i32) {
    %c0_i32 = arith.constant 0 : i32
    %c0_i32_0 = arith.constant 0 : i32
    %c0_i32_1 = arith.constant 0 : i32
    return %c0_i32, %c0_i32_0 : i32, i32
  }
  func.func @transform_3(%arg0: i32) -> (i32, i32) {
    %c0_i32 = arith.constant 0 : i32
    %c0_i32_0 = arith.constant 0 : i32
    %c0_i32_1 = arith.constant 0 : i32
    return %c0_i32, %c0_i32_0 : i32, i32
  }
  func.func @transform_4(%arg0: i32) -> (i32, i32) {
    %c0_i32 = arith.constant 0 : i32
    %c0_i32_0 = arith.constant 0 : i32
    %c0_i32_1 = arith.constant 0 : i32
    return %c0_i32, %c0_i32_0 : i32, i32
  }
  func.func @transform_5(%arg0: i32) -> (i32, i32) {
    %c0_i32 = arith.constant 0 : i32
    %c0_i32_0 = arith.constant 0 : i32
    %c0_i32_1 = arith.constant 0 : i32
    return %c0_i32, %c0_i32_0 : i32, i32
  }
  func.func @transform_6(%arg0: i32) -> (i32, i32) {
    %c0_i32 = arith.constant 0 : i32
    %c0_i32_0 = arith.constant 0 : i32
    %c0_i32_1 = arith.constant 0 : i32
    return %c0_i32, %c0_i32_0 : i32, i32
  }
  func.func @transform_7(%arg0: i32) -> (i32, i32) {
    %c0_i32 = arith.constant 0 : i32
    %c0_i32_0 = arith.constant 0 : i32
    %c0_i32_1 = arith.constant 0 : i32
    return %c0_i32, %c0_i32_0 : i32, i32
  }
  func.func @transform_8(%arg0: i32) -> (i32, i32) {
    %c0_i32 = arith.constant 0 : i32
    %c0_i32_0 = arith.constant 0 : i32
    %c0_i32_1 = arith.constant 0 : i32
    return %c0_i32, %c0_i32_0 : i32, i32
  }
  func.func @transform_9(%arg0: i32) -> (i32, i32) {
    %c0_i32 = arith.constant 0 : i32
    %c0_i32_0 = arith.constant 0 : i32
    return %arg0, %c0_i32 : i32, i32
  }
}

</mosaic_0001>

<bundles_post_ra>
// kernel: tpu_custom_call.1
= control target key start
LH: loop header
LB: loop body
LE: loop exit
PB: predicated region body
PF: predicated region fallthrough
CT: control target
= control target key end

     0   :  { %14 = vsyncpa [#allocation3], 0  ;;  %s1015_s0 = inlined_call_operand.vmem [shape: f32[16,32], index: 0, kind: input, shape index: {}]   ;;  %s1016_s1 = inlined_call_operand.hbm [shape: f32[16,32], index: 1, kind: input, shape index: {}]   ;;  %s1017_s2 = inlined_call_operand.vmem [shape: f32[32,96], index: 2, kind: input, shape index: {}]   ;;  %s1018_s3 = inlined_call_operand.vmem [shape: f32[32,16], index: 3, kind: input, shape index: {}]   ;;  %s1019_s4 = inlined_call_operand.vmem [shape: f32[1,16], index: 4, kind: input, shape index: {}]   ;;  %s1020_s5 = inlined_call_operand.vmem [shape: f32[16,32], index: 5, kind: input, shape index: {}]   ;;  %s1021_s6 = inlined_call_operand.vmem [shape: f32[1,32], index: 6, kind: input, shape index: {}]   ;;  %s1022_s7 = inlined_call_operand.vmem [shape: f32[1,32], index: 7, kind: input, shape index: {}]   ;;  %s1023_s8 = inlined_call_operand.vmem [shape: f32[1,32], index: 8, kind: input, shape index: {}]   ;;  %s1024_s9 = inlined_call_operand.hbm [shape: f32[16,64], index: 9, kind: output, shape index: {}]  }
   0x1   :  { %15 = vsyncpa [#allocation4], 0  ;;  %s802_s30 = smov [#allocation2]   ;;  %s754_s13 = scalar_lea.hbm %s1016_s1, 256 }
   0x2   :  { %s23_s10 = sshll.u32 %s802_s30, 4  ;;  %p755_p0 = scmp.ne.s32.totalorder %s1016_s1, %s754_s13  ;;  %s24_s10 = int_to_ptr.vmem [resolvable:$true] %s23_s10 }
   0x3   :  { %p758_p1 = scmp.lt.u32.totalorder %s754_s13, %s1016_s1 }
   0x5   :  { %p760_p2 = pnand %p758_p1, %p755_p0 }
   0x7   :  { %763 = shalt.err (!%p760_p2)
}
   0x8   :  { %s764_s18 = scalar_lea.vmem %s24_s10, 256  ;;  %p769_p4 = scmp.lt.s32.totalorder %s24_s10, %s24_s10 }
   0x9   :  { %p765_p3 = scmp.ne.s32.totalorder %s24_s10, %s764_s18  ;;  %p770_p5 = scmp.lt.s32.totalorder %s764_s18, %s764_s18 }
   0xb   :  { %p771_p6 = por %p770_p5, %p769_p4 }
   0xd   :  { %p772_p7 = pnand %p771_p6, %p765_p3 }
   0xf   :  { %775 = shalt.err (!%p772_p7)
}
  0x10   :  { %s803_s19 = smov 128   ;;  %s804_s20 = smov 8  }
  0x11   :  { %29 = dma.hbm_to_vmem [thread:$0]  %s1016_s1, 256, %s24_s10, [#allocation3], %s803_s19, %s803_s19, %s804_s20  }
  0x12   :  { %798 = dma.done.wait [#allocation3], 256  }
  0x13   :  { %799 = vsyncadd [#allocation3], 4294967040  ;;  %vm55_vm0 = vcmask 261120   ;;  %v51_v0 = vld [vmem:[%s1017_s2] sm:$0xff]  ;;  %v52_v1 = vld [vmem:[%s1017_s2 + $0x8] sm:$0xff]  ;;  %vm394_vm1 = vcmask 130048  }
  0x14   :  { %v53_v2 = vld [vmem:[%s1017_s2 + $0x10] sm:$0xff]  ;;  %v693_v3 = vpack.c.bf16 %v52_v1, %v51_v0  ;;  %v54_v4 = vld [vmem:[%s1017_s2 + $0x18] sm:$0xff]  ;;  %v47_v5 = vld [vmem:[%s1015_s0] sm:$0xff]  ;;  %s805_s2 = smov 96   ;;  %s807_s1 = smov 32   ;;  %vm597_vm2 = vcmask 523264  }
  0x15   :  { %v697_v6 = vpack.c.bf16 %v54_v4, %v53_v2  ;;  %663 = vmatprep.mubr.msk.f32.mxu0 %vm55_vm0, %v47_v5  ;;  %v48_v7 = vld [vmem:[%s1015_s0 + $0x8] sm:$0xff]  ;;  %v49_v8 = vld [vmem:[#allocation2] sm:$0xff] }
  0x16   :  { %694 = vmatprep.subr.bf16.mxu0 %v693_v3  ;;  %v50_v9 = vld [vmem:[#allocation2 + $0x8] sm:$0xff]  ;;  %v265_v34 = vld [vmem:[%s1018_s3] sm:$0xff] }
  0x17   :  { %696 = vmatpush3.bf16.msra.mxu0 %v693_v3  ;;  %v266_v35 = vld [vmem:[%s1018_s3 + $0x8] sm:$0xff] }
  0x18   :  { %698 = vmatprep.subr.bf16.mxu0 %v697_v6  ;;  %v701_v36 = vpack.c.bf16 %v266_v35, %v265_v34 }
  0x1a   :  { %702 = vmatprep.subr.bf16.mxu1 %v701_v36 }
  0x1b   :  { %700 = vmatpush3.bf16.msra.mxu0 %v697_v6  ;;  %704 = vmatpush3.bf16.msra.mxu1 %v701_v36 }
  0x1e   :  { %664 = vmatmul.mubr.msk.f32.vlgmr.msra.gmra.mrb[0].mxu0 %vm55_vm0, %v48_v7 }
  0x1f   :  { %666 = vmatprep.mubr.msk.f32.mxu0 %vm55_vm0, %v49_v8 }
  0x22   :  { %667 = vmatmul.mubr.msk.f32.gmra.mrb[2].mxu0 %vm55_vm0, %v50_v9 }
  0xf1   :  { %v896_v10 = vpop.f32.mrb[0].mxu0 }
  0xf2   :  { %159 = vrot.lane.b32.xlu1 %v896_v10, %s805_s2  ;;  %v899_v11 = vpop.f32.mrb[1].mxu0 }
  0xf3   :  { %157 = vrot.lane.b32.xlu0 %v899_v11, %s805_s2 }
  0xf5   :  { %v902_v12 = vpop.f32.mrb[2].mxu0 }
  0xf6   :  { %163 = vrot.lane.b32.xlu1 %v902_v12, %s805_s2  ;;  %v905_v13 = vpop.f32.mrb[3].mxu0 }
  0xf7   :  { %161 = vrot.lane.b32.xlu0 %v905_v13, %s805_s2 }
 0x164   :  { %v160_v14 = vpop.permute.xlu1 %159 }
 0x165   :  { %v170_v15 = vmul.f32 %v896_v10, %v160_v14  ;;  %v158_v16 = vpop.permute.xlu0 %157  ;;  %v192_v30 = vmul.f32 %v902_v12, %v160_v14 }
 0x166   :  { %v169_v17 = vmul.f32 %v158_v16, %v899_v11  ;;  %v191_v21 = vmul.f32 %v158_v16, %v905_v13 }
 0x167   :  { %v176_v18 = vsel %vm55_vm0, %v170_v15, 0.0  ;;  %v202_v33 = vsel %vm55_vm0, %v192_v30, 0.0 }
 0x168   :  { %177 = vadd.xlane.f32.xlu0 %v176_v18  ;;  %v173_v22 = vsel %vm55_vm0, %v169_v17, 0.0  ;;  %v164_v23 = vpop.permute.xlu1 %163  ;;  %v199_v27 = vsel %vm55_vm0, %v191_v21, 0.0  ;;  %v267_v21 = vld [vmem:[%s1018_s3 + $0x10] sm:$0xff] }
 0x169   :  { %v162_v19 = vpop.permute.xlu0 %161  ;;  %v190_v26 = vmul.f32 %v896_v10, %v164_v23  ;;  %v172_v28 = vmul.f32 %v902_v12, %v164_v23 }
 0x16a   :  { %v189_v20 = vmul.f32 %v162_v19, %v899_v11  ;;  %v171_v24 = vmul.f32 %v162_v19, %v905_v13 }
 0x16b   :  { %v196_v31 = vsel %vm55_vm0, %v190_v26, 0.0  ;;  %v182_v32 = vsel %vm55_vm0, %v172_v28, 0.0 }
 0x16c   :  { %174 = vadd.xlane.f32.xlu0 %v173_v22  ;;  %v193_v25 = vsel %vm55_vm0, %v189_v20, 0.0  ;;  %v179_v29 = vsel %vm55_vm0, %v171_v24, 0.0  ;;  %v268_v22 = vld [vmem:[%s1018_s3 + $0x18] sm:$0xff]  ;;  %s806_s3 = smov 64  }
 0x16d   :  { %194 = vadd.xlane.f32.xlu1 %v193_v25  ;;  %v705_v24 = vpack.c.bf16 %v268_v22, %v267_v21 }
 0x16f   :  { %706 = vmatprep.subr.bf16.mxu1 %v705_v24 }
 0x170   :  { %200 = vadd.xlane.f32.xlu0 %v199_v27  ;;  %708 = vmatpush3.bf16.msra.mxu1 %v705_v24 }
 0x171   :  { %180 = vadd.xlane.f32.xlu1 %v179_v29 }
 0x174   :  { %197 = vadd.xlane.f32.xlu0 %v196_v31 }
 0x175   :  { %183 = vadd.xlane.f32.xlu1 %v182_v32 }
 0x178   :  { %203 = vadd.xlane.f32.xlu0 %v202_v33 }
 0x1f5   :  { %v178_v37 = vpop.xlane.xlu0 %177 }
 0x1f6   :  { %v186_v53 = vmul.f32 0.17677669, %v178_v37 }
 0x1f9   :  { %v175_v38 = vpop.xlane.xlu0 %174 }
 0x1fa   :  { %v185_v39 = vmul.f32 0.17677669, %v175_v38  ;;  %v195_v40 = vpop.xlane.xlu1 %194 }
 0x1fb   :  { %v205_v41 = vmul.f32 0.17677669, %v195_v40 }
 0x1fd   :  { %v209_v42 = vmax.f32 %v185_v39, %v205_v41  ;;  %v201_v43 = vpop.xlane.xlu0 %200 }
 0x1fe   :  { %v207_v44 = vmul.f32 0.17677669, %v201_v43  ;;  %v181_v45 = vpop.xlane.xlu1 %180 }
 0x1ff   :  { %v213_v46 = vsub.f32 %v185_v39, %v209_v42  ;;  %v225_v47 = vsub.f32 %v205_v41, %v209_v42  ;;  %v187_v48 = vmul.f32 0.17677669, %v181_v45 }
 0x201   :  { %v217_v49 = vmul.f32 1.442695, %v213_v46  ;;  %v229_v50 = vmul.f32 1.442695, %v225_v47  ;;  %v211_v51 = vmax.f32 %v187_v48, %v207_v44  ;;  %v198_v52 = vpop.xlane.xlu0 %197 }
 0x202   :  { %v206_v54 = vmul.f32 0.17677669, %v198_v52  ;;  %v184_v57 = vpop.xlane.xlu1 %183 }
 0x203   :  { %722 = vpow2.f32 %v217_v49  ;;  %v215_v55 = vsub.f32 %v187_v48, %v211_v51  ;;  %v227_v56 = vsub.f32 %v207_v44, %v211_v51  ;;  %v188_v0 = vmul.f32 0.17677669, %v184_v57 }
 0x204   :  { %724 = vpow2.f32 %v229_v50  ;;  %v210_v58 = vmax.f32 %v186_v53, %v206_v54 }
 0x205   :  { %v221_v59 = vmul.f32 1.442695, %v215_v55  ;;  %v233_v60 = vmul.f32 1.442695, %v227_v56  ;;  %v204_v61 = vpop.xlane.xlu0 %203  ;;  %v621_v55 = vld [vmem:[%s1019_s4] ss:$0 sm:$0xff] }
 0x206   :  { %v214_v62 = vsub.f32 %v186_v53, %v210_v58  ;;  %v226_v63 = vsub.f32 %v206_v54, %v210_v58  ;;  %v208_v1 = vmul.f32 0.17677669, %v204_v61 }
 0x207   :  { %726 = vpow2.f32 %v221_v59 }
 0x208   :  { %728 = vpow2.f32 %v233_v60  ;;  %v219_v2 = vmul.f32 1.442695, %v214_v62  ;;  %v231_v3 = vmul.f32 1.442695, %v226_v63  ;;  %v212_v4 = vmax.f32 %v188_v0, %v208_v1 }
 0x20a   :  { %730 = vpow2.f32 %v219_v2  ;;  %v216_v5 = vsub.f32 %v188_v0, %v212_v4  ;;  %v228_v6 = vsub.f32 %v208_v1, %v212_v4 }
 0x20b   :  { %732 = vpow2.f32 %v231_v3 }
 0x20c   :  { %v223_v7 = vmul.f32 1.442695, %v216_v5  ;;  %v235_v8 = vmul.f32 1.442695, %v228_v6  ;;  %v626_v6 = vld [vmem:[%s1021_s6] ss:$0 sm:$0xff] }
 0x20d   :  { %v723_v9 = vpop.eup %722 }
 0x20e   :  { %v725_v14 = vpop.eup %724  ;;  %734 = vpow2.f32 %v223_v7 }
 0x20f   :  { %v237_v15 = vadd.f32 %v725_v14, %v723_v9  ;;  %736 = vpow2.f32 %v235_v8 }
 0x211   :  { %v727_v16 = vpop.eup %726  ;;  %738 = vrcp.f32 %v237_v15 }
 0x212   :  { %v729_v17 = vpop.eup %728 }
 0x213   :  { %v239_v18 = vadd.f32 %v729_v17, %v727_v16 }
 0x214   :  { %v731_v19 = vpop.eup %730 }
 0x215   :  { %v733_v20 = vpop.eup %732  ;;  %740 = vrcp.f32 %v239_v18 }
 0x216   :  { %v238_v23 = vadd.f32 %v733_v20, %v731_v19 }
 0x218   :  { %v735_v25 = vpop.eup %734  ;;  %742 = vrcp.f32 %v238_v23 }
 0x219   :  { %v737_v26 = vpop.eup %736 }
 0x21a   :  { %v240_v27 = vadd.f32 %v737_v26, %v735_v25 }
 0x21b   :  { %v739_v28 = vpop.eup %738 }
 0x21c   :  { %744 = vrcp.f32 %v240_v27  ;;  %v245_v29 = vmul.f32 %v739_v28, %v723_v9  ;;  %v253_v30 = vmul.f32 %v739_v28, %v725_v14 }
 0x21e   :  { %v249_v31 = vmul.f32 %v245_v29, %v899_v11  ;;  %v257_v32 = vmul.f32 %v253_v30, %v905_v13 }
 0x21f   :  { %v741_v33 = vpop.eup %740 }
 0x220   :  { %v261_v34 = vadd.f32 %v257_v32, %v249_v31  ;;  %v247_v35 = vmul.f32 %v741_v33, %v727_v16  ;;  %v255_v36 = vmul.f32 %v741_v33, %v729_v17 }
 0x222   :  { %v743_v37 = vpop.eup %742  ;;  %280 = vrot.lane.b32.xlu1 %v261_v34, %s806_s3  ;;  %v251_v38 = vmul.f32 %v247_v35, %v905_v13  ;;  %v259_v39 = vmul.f32 %v255_v36, %v899_v11 }
 0x223   :  { %v246_v40 = vmul.f32 %v743_v37, %v731_v19  ;;  %v254_v41 = vmul.f32 %v743_v37, %v733_v20 }
 0x224   :  { %v263_v42 = vadd.f32 %v259_v39, %v251_v38 }
 0x225   :  { %v250_v43 = vmul.f32 %v896_v10, %v246_v40  ;;  %v258_v44 = vmul.f32 %v902_v12, %v254_v41 }
 0x226   :  { %v745_v45 = vpop.eup %744  ;;  %284 = vrot.lane.b32.xlu1 %v263_v42, %s806_s3 }
 0x227   :  { %v262_v46 = vadd.f32 %v258_v44, %v250_v43  ;;  %v248_v47 = vmul.f32 %v745_v45, %v735_v25  ;;  %v256_v48 = vmul.f32 %v745_v45, %v737_v26 }
 0x229   :  { %282 = vrot.lane.b32.xlu0 %v262_v46, %s806_s3  ;;  %v252_v49 = vmul.f32 %v902_v12, %v248_v47  ;;  %v260_v50 = vmul.f32 %v896_v10, %v256_v48  ;;  %v385_v12 = vld [vmem:[%s1020_s5] sm:$0xff]  ;;  %v386_v10 = vld [vmem:[%s1020_s5 + $0x8] sm:$0xff] }
 0x22a   :  { %v709_v54 = vpack.c.bf16 %v386_v10, %v385_v12 }
 0x22b   :  { %v264_v13 = vadd.f32 %v260_v50, %v252_v49 }
 0x22c   :  { %713 = vmatprep.subr.bf16.mxu1 %v709_v54  ;;  %710 = vmatprep.subr.bf16.mxu0 %v709_v54 }
 0x22d   :  { %286 = vrot.lane.b32.xlu1 %v264_v13, %s806_s3  ;;  %712 = vmatpush3.bf16.msra.mxu0 %v709_v54 }
 0x294   :  { %v281_v11 = vpop.permute.xlu1 %280 }
 0x295   :  { %677 = vmatprep.mubr.msk.f32.mxu1 %vm55_vm0, %v281_v11 }
 0x298   :  { %v285_v51 = vpop.permute.xlu1 %284 }
 0x29b   :  { %v283_v52 = vpop.permute.xlu0 %282 }
 0x29c   :  { %678 = vmatmul.mubr.msk.f32.vlgmr.msra.gmra.mrb[0].mxu1 %vm55_vm0, %v283_v52 }
 0x29d   :  { %680 = vmatprep.mubr.msk.f32.mxu1 %vm55_vm0, %v285_v51  ;;  %714 = vmatpush3.bf16.msra.mxu1 %v709_v54 }
 0x29f   :  { %v287_v53 = vpop.permute.xlu1 %286 }
 0x2a0   :  { %681 = vmatmul.mubr.msk.f32.gmra.mrb[2].mxu1 %vm55_vm0, %v287_v53 }
 0x36f   :  { %v679_v56 = vpop.f32.mrb[0].mxu1 }
 0x370   :  { %v368_v57 = vadd.f32 %v679_v56, %v621_v55  ;;  %v362_v58 = vpop.f32.mrb[1].mxu1 }
 0x371   :  { %v363_v59 = vadd.f32 %v621_v55, %v362_v58 }
 0x372   :  { %v382_v62 = vmax.f32 %v368_v57, 0.0 }
 0x373   :  { %v381_v60 = vmax.f32 %v363_v59, 0.0  ;;  %v682_v61 = vpop.f32.mrb[2].mxu1 }
 0x374   :  { %v378_v63 = vadd.f32 %v682_v61, %v621_v55  ;;  %v372_v0 = vpop.f32.mrb[3].mxu1 }
 0x375   :  { %v373_v1 = vadd.f32 %v621_v55, %v372_v0  ;;  %687 = vmatprep.mubr.msk.f32.mxu0 %vm394_vm1, %v381_v60 }
 0x376   :  { %688 = vmatmul.mubr.msk.f32.vlgmr.msra.gmra.mrb[4].mxu0 %vm394_vm1, %v382_v62  ;;  %v384_v3 = vmax.f32 %v378_v63, 0.0  ;;  %v631_v63 = vld [vmem:[%s1022_s7] ss:$0 sm:$0xff]  ;;  %s808_s7 = smov [#allocation5]  }
 0x377   :  { %v383_v2 = vmax.f32 %v373_v1, 0.0 }
 0x379   :  { %690 = vmatprep.mubr.msk.f32.mxu1 %vm394_vm1, %v383_v2  ;;  %v632_v2 = vld [vmem:[%s1023_s8] ss:$0 sm:$0xff]  ;;  %s605_s8 = sshll.u32 %s808_s7, 4  ;;  %s606_s8 = int_to_ptr.vmem [resolvable:$true] %s605_s8 }
 0x37a   :  { %691 = vmatmul.mubr.msk.f32.vlgmr.msra.gmra.mrb[4].mxu1 %vm394_vm1, %v384_v3  ;;  %s776_s10 = scalar_lea.vmem %s606_s8, 256  ;;  %p781_p9 = scmp.lt.s32.totalorder %s606_s8, %s606_s8 }
 0x37b   :  { %p777_p8 = scmp.ne.s32.totalorder %s606_s8, %s776_s10  ;;  %p782_p10 = scmp.lt.s32.totalorder %s776_s10, %s776_s10 }
 0x37d   :  { %p783_p11 = por %p782_p10, %p781_p9 }
 0x37f   :  { %p784_p12 = pnand %p783_p11, %p777_p8 }
 0x449   :  { %v689_v4 = vpop.f32.mrb[4].mxu0 }
 0x44a   :  { %v473_v5 = vpop.f32.mrb[5].mxu0  ;;  %v479_v24 = vadd.f32 %v689_v4, %v626_v6 }
 0x44b   :  { %v474_v8 = vadd.f32 %v626_v6, %v473_v5 }
 0x44c   :  { %v980_v28 = vadd.f32 %v479_v24, %v283_v52 }
 0x44d   :  { %v692_v7 = vpop.f32.mrb[4].mxu1  ;;  %v964_v18 = vadd.f32 %v474_v8, %v281_v11 }
 0x44e   :  { %v489_v9 = vadd.f32 %v692_v7, %v626_v6  ;;  %v483_v14 = vpop.f32.mrb[5].mxu1  ;;  %v503_v30 = vsel %vm55_vm0, %v980_v28, 0.0  ;;  %v518_v31 = vmul.f32 %v980_v28, %v980_v28 }
 0x44f   :  { %v484_v15 = vadd.f32 %v626_v6, %v483_v14  ;;  %v500_v22 = vsel %vm55_vm0, %v964_v18, 0.0  ;;  %v517_v23 = vmul.f32 %v964_v18, %v964_v18 }
 0x450   :  { %v960_v16 = vadd.f32 %v489_v9, %v287_v53  ;;  %v524_v32 = vsel %vm55_vm0, %v518_v31, 0.0 }
 0x451   :  { %v962_v17 = vadd.f32 %v484_v15, %v285_v51  ;;  %v521_v27 = vsel %vm55_vm0, %v517_v23, 0.0 }
 0x452   :  { %v509_v19 = vsel %vm55_vm0, %v960_v16, 0.0  ;;  %v520_v26 = vmul.f32 %v960_v16, %v960_v16 }
 0x453   :  { %510 = vadd.xlane.f32.xlu1 %v509_v19  ;;  %v506_v20 = vsel %vm55_vm0, %v962_v17, 0.0  ;;  %v519_v21 = vmul.f32 %v962_v17, %v962_v17 }
 0x454   :  { %507 = vadd.xlane.f32.xlu0 %v506_v20  ;;  %v530_v29 = vsel %vm55_vm0, %v520_v26, 0.0 }
 0x455   :  { %v527_v25 = vsel %vm55_vm0, %v519_v21, 0.0 }
 0x457   :  { %501 = vadd.xlane.f32.xlu1 %v500_v22 }
 0x458   :  { %528 = vadd.xlane.f32.xlu0 %v527_v25 }
 0x45b   :  { %522 = vadd.xlane.f32.xlu1 %v521_v27 }
 0x45c   :  { %531 = vadd.xlane.f32.xlu0 %v530_v29 }
 0x460   :  { %504 = vadd.xlane.f32.xlu0 %v503_v30 }
 0x464   :  { %525 = vadd.xlane.f32.xlu0 %v524_v32 }
 0x4e0   :  { %v511_v33 = vpop.xlane.xlu1 %510 }
 0x4e1   :  { %v508_v34 = vpop.xlane.xlu0 %507  ;;  %v516_v39 = vmul.f32 0.03125, %v511_v33 }
 0x4e2   :  { %v515_v35 = vmul.f32 0.03125, %v508_v34 }
 0x4e3   :  { %v540_v47 = vmul.f32 %v516_v39, %v516_v39  ;;  %v552_v4 = vsub.f32 %v960_v16, %v516_v39 }
 0x4e4   :  { %v502_v36 = vpop.xlane.xlu1 %501  ;;  %v539_v40 = vmul.f32 %v515_v35, %v515_v35  ;;  %v551_v60 = vsub.f32 %v962_v17, %v515_v35 }
 0x4e5   :  { %v513_v37 = vmul.f32 0.03125, %v502_v36  ;;  %v529_v38 = vpop.xlane.xlu0 %528 }
 0x4e6   :  { %v535_v41 = vmul.f32 0.03125, %v529_v38 }
 0x4e7   :  { %v537_v44 = vmul.f32 %v513_v37, %v513_v37  ;;  %v549_v1 = vsub.f32 %v964_v18, %v513_v37 }
 0x4e8   :  { %v543_v42 = vsub.f32 %v535_v41, %v539_v40  ;;  %v523_v43 = vpop.xlane.xlu1 %522 }
 0x4e9   :  { %v533_v45 = vmul.f32 0.03125, %v523_v43  ;;  %v532_v46 = vpop.xlane.xlu0 %531 }
 0x4ea   :  { %v547_v48 = vmax.f32 %v543_v42, 0.0  ;;  %v536_v49 = vmul.f32 0.03125, %v532_v46 }
 0x4eb   :  { %v541_v50 = vsub.f32 %v533_v45, %v537_v44 }
 0x4ec   :  { %v555_v13 = vadd.f32 1e-06, %v547_v48  ;;  %v544_v11 = vsub.f32 %v536_v49, %v540_v47 }
 0x4ed   :  { %v545_v51 = vmax.f32 %v541_v50, 0.0  ;;  %v505_v52 = vpop.xlane.xlu0 %504 }
 0x4ee   :  { %746 = vrsqrt.f32 %v555_v13  ;;  %v548_v53 = vmax.f32 %v544_v11, 0.0  ;;  %v514_v12 = vmul.f32 0.03125, %v505_v52 }
 0x4ef   :  { %v553_v10 = vadd.f32 1e-06, %v545_v51 }
 0x4f0   :  { %v556_v54 = vadd.f32 1e-06, %v548_v53  ;;  %v538_v56 = vmul.f32 %v514_v12, %v514_v12  ;;  %v550_v18 = vsub.f32 %v980_v28, %v514_v12 }
 0x4f1   :  { %748 = vrsqrt.f32 %v553_v10  ;;  %v526_v55 = vpop.xlane.xlu0 %525 }
 0x4f2   :  { %750 = vrsqrt.f32 %v556_v54  ;;  %v534_v57 = vmul.f32 0.03125, %v526_v55 }
 0x4f4   :  { %v542_v58 = vsub.f32 %v534_v57, %v538_v56 }
 0x4f6   :  { %v546_v59 = vmax.f32 %v542_v58, 0.0 }
 0x4f8   :  { %v747_v61 = vpop.eup %746  ;;  %v554_v62 = vadd.f32 1e-06, %v546_v59 }
 0x4f9   :  { %v563_v0 = vmul.f32 %v747_v61, %v551_v60 }
 0x4fa   :  { %752 = vrsqrt.f32 %v554_v62 }
 0x4fb   :  { %v749_v3 = vpop.eup %748  ;;  %v574_v5 = vmul.f32 %v631_v63, %v563_v0 }
 0x4fc   :  { %v751_v6 = vpop.eup %750  ;;  %v561_v7 = vmul.f32 %v749_v3, %v549_v1 }
 0x4fd   :  { %v585_v8 = vadd.f32 %v632_v2, %v574_v5  ;;  %v564_v9 = vmul.f32 %v751_v6, %v552_v4 }
 0x4fe   :  { %v572_v14 = vmul.f32 %v631_v63, %v561_v7 }
 0x4ff   :  { %589 = vrot.lane.b32.xlu1 %v585_v8, %s807_s1  ;;  %v575_v15 = vmul.f32 %v631_v63, %v564_v9 }
 0x500   :  { %v583_v17 = vadd.f32 %v632_v2, %v572_v14 }
 0x501   :  { %v586_v19 = vadd.f32 %v632_v2, %v575_v15 }
 0x503   :  { %591 = vrot.lane.b32.xlu0 %v586_v19, %s807_s1 }
 0x504   :  { %v753_v20 = vpop.eup %752 }
 0x505   :  { %v562_v21 = vmul.f32 %v753_v20, %v550_v18 }
 0x507   :  { %v573_v22 = vmul.f32 %v631_v63, %v562_v21 }
 0x509   :  { %v584_v23 = vadd.f32 %v632_v2, %v573_v22 }
 0x571   :  { %v590_v16 = vpop.permute.xlu1 %589 }
 0x572   :  { %v595_v24 = vsel %vm55_vm0, %v583_v17, %v590_v16 }
 0x573   :  { %598 = vst.msk [vmem:[#allocation5] sm:$0xff] %vm597_vm2, %v595_v24 }
 0x575   :  { %v592_v25 = vpop.permute.xlu0 %591 }
 0x576   :  { %v596_v26 = vsel %vm55_vm0, %v584_v23, %v592_v25 }
 0x577   :  { %599 = vst.msk [vmem:[#allocation5 + $0x8] sm:$0xff] %vm597_vm2, %v596_v26 }
 0x578   :  { %787 = shalt.err (!%p784_p12)
}
 0x579   :  { %s788_s2 = scalar_lea.hbm %s1024_s9, 256 }
 0x57a   :  { %p789_p13 = scmp.ne.s32.totalorder %s1024_s9, %s788_s2  ;;  %p792_p0 = scmp.lt.u32.totalorder %s788_s2, %s1024_s9 }
 0x57c   :  { %p794_p1 = pnand %p792_p0, %p789_p13 }
 0x57e   :  { %797 = shalt.err (!%p794_p1)
}
 0x57f   :  { %611 = dma.vmem_to_hbm [thread:$0]  %s606_s8, 256, %s1024_s9, [#allocation4], %s803_s19, %s803_s19, %s804_s20  }
 0x580   :  { %800 = dma.done.wait [#allocation4], 256  }
 0x581   :  { %801 = vsyncadd [#allocation4], 4294967040 }
 0x582   :  { %615 = vsyncpa [#allocation3], 1 }
 0x583   :  { %616 = vsyncpa [#allocation4], 1 }

</bundles_post_ra>
